<compile_context>
chip_gen: v7x
topology: tpu7x:2x2x1
jax: 0.10.0
libtpu: 0.0.40
codegen_flags: <defaults>
</compile_context>

<pallas_src>
import jax
import jax.numpy as jnp
from jax.experimental import pallas as pl
from jax.experimental.pallas import tpu as pltpu

_LANE = 128
_SUBLANE = 8


def _round_up(n, m):
    return ((n + m - 1) // m) * m


def _mlp_kernel(x_ref, w1_ref, b1_ref, w2_ref, b2_ref, w3_ref, b3_ref, o_ref):
    # One batch tile per grid step; all weights stay VMEM-resident across the
    # whole grid (constant index maps).  Intermediates never touch HBM.
    # Zero-padded hidden rows/columns contribute zeros, so the real lanes are
    # numerically identical to the unpadded computation.
    x = x_ref[...]
    h1 = jnp.dot(x, w1_ref[...], preferred_element_type=jnp.float32) + b1_ref[...]
    h1 = jnp.maximum(h1, 0.0)                        # ReLU (Dropout = identity, eval)
    h1 = h1.astype(w2_ref.dtype)                     # back to bf16 if weights are bf16
    h2 = jnp.dot(h1, w2_ref[...], preferred_element_type=jnp.float32) + b2_ref[...]
    h2 = jnp.maximum(h2, 0.0)                        # ReLU (Dropout = identity, eval)
    h2 = h2.astype(w3_ref.dtype)
    logits = jnp.dot(h2, w3_ref[...], preferred_element_type=jnp.float32) + b3_ref[...]
    o_ref[...] = jax.nn.sigmoid(logits).astype(o_ref.dtype)   # exp -> EUP


def _pad2d(a, rows, cols):
    r, c = a.shape
    return jnp.pad(a, ((0, rows - r), (0, cols - c)))


def prepare_params(params, compute_dtype=jnp.float32):
    """Pad hidden dims to multiples of 128 and cast weights ONCE (hoisted out
    of the per-call hot path).  The output dim of w3/b3 is left unpadded.
    Biases stay float32 (added to the f32 accumulator)."""
    w1, b1, w2, b2, w3, b3 = (params[k] for k in ("w1", "b1", "w2", "b2", "w3", "b3"))
    input_dim = w1.shape[0]
    h1p = _round_up(w1.shape[1], _LANE)
    h2p = _round_up(w2.shape[1], _LANE)
    num_classes = w3.shape[1]
    return {
        "w1": _pad2d(w1, input_dim, h1p).astype(compute_dtype),
        "b1": _pad2d(b1, 1, h1p).astype(jnp.float32),
        "w2": _pad2d(w2, h1p, h2p).astype(compute_dtype),
        "b2": _pad2d(b2, 1, h2p).astype(jnp.float32),
        "w3": _pad2d(w3, h2p, num_classes).astype(compute_dtype),
        "b3": b3.astype(jnp.float32),
    }


def classifier_forward(x, padded_params, *, tile_b=2048):
    """x: [B, input_dim].  padded_params: output of prepare_params()."""
    p = padded_params
    B, input_dim = x.shape
    h1p = p["w1"].shape[1]
    h2p = p["w2"].shape[1]
    num_classes = p["w3"].shape[1]
    compute_dtype = p["w1"].dtype

    # ---- batch tiling: block sublane dim must be a multiple of 8.  No jnp.pad
    # of x: grid = cdiv(B, tile_b) and Pallas masks the trailing block's
    # out-of-bounds writes (row-independent math keeps valid rows exact).
    b8 = _round_up(B, _SUBLANE)
    tile_b = min(tile_b, b8)
    # Keep >= 2 grid steps when the batch allows it so v7x's second TensorCore
    # gets work via the "parallel" batch axis (no-op cost on v5e/v6e).
    if b8 > _SUBLANE and tile_b >= b8:
        tile_b = (b8 + 1) // 2
    tile_b = max(_SUBLANE, _round_up(tile_b, _SUBLANE))
    grid = (pl.cdiv(B, tile_b),)

    x = x.astype(compute_dtype)
    itemsize = jnp.dtype(compute_dtype).itemsize

    cost = pl.CostEstimate(
        flops=2 * B * (input_dim * h1p + h1p * h2p + h2p * num_classes),
        transcendentals=B * num_classes,
        bytes_accessed=(itemsize * (B * input_dim
                                    + input_dim * h1p + h1p * h2p + h2p * num_classes)
                        + 4 * (B * num_classes + h1p + h2p + num_classes)),
    )

    # Constant index_map -> DMA'd once, VMEM-resident; single buffer suffices.
    def const(arr):
        return pl.BlockSpec(arr.shape, lambda i: (0, 0), pipeline_mode=pl.Buffered(1))

    out = pl.pallas_call(
        _mlp_kernel,
        out_shape=jax.ShapeDtypeStruct((B, num_classes), jnp.float32),
        grid=grid,
        in_specs=[
            pl.BlockSpec((tile_b, input_dim), lambda i: (i, 0)),   # x: tiled over batch
            const(p["w1"]), const(p["b1"]),
            const(p["w2"]), const(p["b2"]),
            const(p["w3"]), const(p["b3"]),
        ],
        out_specs=pl.BlockSpec((tile_b, num_classes), lambda i: (i, 0)),
        compiler_params=pltpu.CompilerParams(
            dimension_semantics=("parallel",),                      # megacore on v7x
        ),
        cost_estimate=cost,
    )(x, p["w1"], p["b1"], p["w2"], p["b2"], p["w3"], p["b3"])
    return out


def init_params(key, input_dim, hidden_dim, num_classes):
    """Deterministic init mimicking PyTorch nn.Linear default U(-1/sqrt(fan_in), +)."""
    dims = [(input_dim, hidden_dim),
            (hidden_dim, hidden_dim // 2),
            (hidden_dim // 2, num_classes)]
    params = {}
    keys = jax.random.split(key, 2 * len(dims))
    for i, (fan_in, fan_out) in enumerate(dims):
        bound = 1.0 / (fan_in ** 0.5)
        params[f"w{i+1}"] = jax.random.uniform(
            keys[2 * i], (fan_in, fan_out), jnp.float32, -bound, bound)
        params[f"b{i+1}"] = jax.random.uniform(
            keys[2 * i + 1], (1, fan_out), jnp.float32, -bound, bound)
    return params


if __name__ == "__main__":
    input_dim, hidden_dim, num_classes = 32, 32, 4
    batch = 8

    key = jax.random.PRNGKey(0)
    k_x, k_p = jax.random.split(key)
    x = jax.random.normal(k_x, (batch, input_dim), dtype=jnp.float32)
    params = init_params(k_p, input_dim, hidden_dim, num_classes)

    def reference(xv):
        h1 = jnp.maximum(xv @ params["w1"] + params["b1"], 0.0)
        h2 = jnp.maximum(h1 @ params["w2"] + params["b2"], 0.0)
        return jax.nn.sigmoid(h2 @ params["w3"] + params["b3"])

    # ---- float32 path (exact vs pure-JAX reference)
    pp_f32 = prepare_params(params, jnp.float32)          # padded once, reused
    out = jax.block_until_ready(classifier_forward(x, pp_f32))
    assert out.shape == (batch, num_classes)
    assert jnp.max(jnp.abs(out - reference(x))) < 1e-5

    # ---- batch not a multiple of the tile -> trailing partial block (masked writes)
    x2 = jax.random.normal(jax.random.PRNGKey(1), (19, input_dim), dtype=jnp.float32)
    out2 = jax.block_until_ready(classifier_forward(x2, pp_f32, tile_b=16))
    assert out2.shape == (19, num_classes)
    assert jnp.max(jnp.abs(out2 - reference(x2))) < 1e-5

    # ---- bf16 weights/activations (v6e/v7x MXU rate + halved DMA bytes)
    pp_bf16 = prepare_params(params, jnp.bfloat16)
    out3 = jax.block_until_ready(classifier_forward(x, pp_bf16))
    assert out3.shape == (batch, num_classes)
    assert jnp.max(jnp.abs(out3 - reference(x))) < 3e-2   # bf16 tolerance

    print("KERNEL_OK")
</pallas_src>

<mosaic_0001>
module attributes {stable_mosaic.version = 11 : i64} {
  func.func @_mlp_kernel(%arg0: i32, %arg1: memref<8x32xf32, #tpu.memory_space<vmem>>, %arg2: memref<32x128xf32, #tpu.memory_space<vmem>>, %arg3: memref<1x128xf32, #tpu.memory_space<vmem>>, %arg4: memref<128x128xf32, #tpu.memory_space<vmem>>, %arg5: memref<1x128xf32, #tpu.memory_space<vmem>>, %arg6: memref<128x4xf32, #tpu.memory_space<vmem>>, %arg7: memref<1x4xf32, #tpu.memory_space<vmem>>, %arg8: memref<8x4xf32, #tpu.memory_space<vmem>>) attributes {dimension_semantics = [#tpu.dimension_semantics<parallel>], iteration_bounds = array<i64: 1>, scalar_prefetch = 0 : i64, scratch_operands = 0 : i64, tpu.core_type = #tpu.core_type<tc>, window_params = [{transform_indices = @transform_0, window_bounds = array<i64: 8, 32>}, {pipeline_mode = #tpu.pipeline_mode<synchronous>, transform_indices = @transform_1, window_bounds = array<i64: 32, 128>}, {pipeline_mode = #tpu.pipeline_mode<synchronous>, transform_indices = @transform_2, window_bounds = array<i64: 1, 128>}, {pipeline_mode = #tpu.pipeline_mode<synchronous>, transform_indices = @transform_3, window_bounds = array<i64: 128, 128>}, {pipeline_mode = #tpu.pipeline_mode<synchronous>, transform_indices = @transform_4, window_bounds = array<i64: 1, 128>}, {pipeline_mode = #tpu.pipeline_mode<synchronous>, transform_indices = @transform_5, window_bounds = array<i64: 128, 4>}, {pipeline_mode = #tpu.pipeline_mode<synchronous>, transform_indices = @transform_6, window_bounds = array<i64: 1, 4>}, {transform_indices = @transform_7, window_bounds = array<i64: 8, 4>}]} {
    %c0 = arith.constant 0 : index
    %c0_0 = arith.constant 0 : index
    %0 = vector.load %arg1[%c0, %c0_0] : memref<8x32xf32, #tpu.memory_space<vmem>>, vector<8x32xf32>
    %c0_1 = arith.constant 0 : index
    %c0_2 = arith.constant 0 : index
    %1 = vector.load %arg2[%c0_1, %c0_2] : memref<32x128xf32, #tpu.memory_space<vmem>>, vector<32x128xf32>
    %cst = arith.constant dense<0.000000e+00> : vector<8x128xf32>
    %2 = tpu.matmul %0, %1, %cst {dimension_numbers = #tpu.dot_dimension_numbers<[1], [0], [0], [1], [0, 0, 1, 1], [], []>} : vector<8x32xf32>, vector<32x128xf32>, vector<8x128xf32> -> vector<8x128xf32>
    %c0_3 = arith.constant 0 : index
    %c0_4 = arith.constant 0 : index
    %3 = vector.load %arg3[%c0_3, %c0_4] : memref<1x128xf32, #tpu.memory_space<vmem>>, vector<1x128xf32>
    %4 = vector.broadcast %3 : vector<1x128xf32> to vector<8x128xf32>
    %5 = arith.addf %2, %4 : vector<8x128xf32>
    %cst_5 = arith.constant 0.000000e+00 : f32
    %6 = vector.broadcast %cst_5 : f32 to vector<8x128xf32>
    %7 = arith.maximumf %5, %6 : vector<8x128xf32>
    %c0_6 = arith.constant 0 : index
    %c0_7 = arith.constant 0 : index
    %8 = vector.load %arg4[%c0_6, %c0_7] : memref<128x128xf32, #tpu.memory_space<vmem>>, vector<128x128xf32>
    %cst_8 = arith.constant dense<0.000000e+00> : vector<8x128xf32>
    %9 = tpu.matmul %7, %8, %cst_8 {dimension_numbers = #tpu.dot_dimension_numbers<[1], [0], [0], [1], [0, 0, 1, 1], [], []>} : vector<8x128xf32>, vector<128x128xf32>, vector<8x128xf32> -> vector<8x128xf32>
    %c0_9 = arith.constant 0 : index
    %c0_10 = arith.constant 0 : index
    %10 = vector.load %arg5[%c0_9, %c0_10] : memref<1x128xf32, #tpu.memory_space<vmem>>, vector<1x128xf32>
    %11 = vector.broadcast %10 : vector<1x128xf32> to vector<8x128xf32>
    %12 = arith.addf %9, %11 : vector<8x128xf32>
    %cst_11 = arith.constant 0.000000e+00 : f32
    %13 = vector.broadcast %cst_11 : f32 to vector<8x128xf32>
    %14 = arith.maximumf %12, %13 : vector<8x128xf32>
    %c0_12 = arith.constant 0 : index
    %c0_13 = arith.constant 0 : index
    %15 = vector.load %arg6[%c0_12, %c0_13] : memref<128x4xf32, #tpu.memory_space<vmem>>, vector<128x4xf32>
    %cst_14 = arith.constant dense<0.000000e+00> : vector<8x4xf32>
    %16 = tpu.matmul %14, %15, %cst_14 {dimension_numbers = #tpu.dot_dimension_numbers<[1], [0], [0], [1], [0, 0, 1, 1], [], []>} : vector<8x128xf32>, vector<128x4xf32>, vector<8x4xf32> -> vector<8x4xf32>
    %c0_15 = arith.constant 0 : index
    %c0_16 = arith.constant 0 : index
    %17 = vector.load %arg7[%c0_15, %c0_16] : memref<1x4xf32, #tpu.memory_space<vmem>>, vector<1x4xf32>
    %18 = vector.broadcast %17 : vector<1x4xf32> to vector<8x4xf32>
    %19 = arith.addf %16, %18 : vector<8x4xf32>
    %20 = arith.negf %19 : vector<8x4xf32>
    %21 = math.exp %20 : vector<8x4xf32>
    %cst_17 = arith.constant 1.000000e+00 : f32
    %22 = vector.broadcast %cst_17 : f32 to vector<8x4xf32>
    %23 = arith.addf %22, %21 : vector<8x4xf32>
    %24 = arith.divf %22, %23 : vector<8x4xf32>
    %c0_18 = arith.constant 0 : index
    %c0_19 = arith.constant 0 : index
    %25 = vector.load %arg8[%c0_18, %c0_19] : memref<8x4xf32, #tpu.memory_space<vmem>>, vector<8x4xf32>
    tpu.vector_store %arg8[%c0_18, %c0_19], %24 {strides = array<i32>} : memref<8x4xf32, #tpu.memory_space<vmem>>, vector<8x4xf32>,
    return
  }
  func.func @transform_0(%arg0: i32) -> (i32, i32) {
    %c0_i32 = arith.constant 0 : i32
    %c0_i32_0 = arith.constant 0 : i32
    return %arg0, %c0_i32 : i32, i32
  }
  func.func @transform_1(%arg0: i32) -> (i32, i32) {
    %c0_i32 = arith.constant 0 : i32
    %c0_i32_0 = arith.constant 0 : i32
    %c0_i32_1 = arith.constant 0 : i32
    return %c0_i32, %c0_i32_0 : i32, i32
  }
  func.func @transform_2(%arg0: i32) -> (i32, i32) {
    %c0_i32 = arith.constant 0 : i32
    %c0_i32_0 = arith.constant 0 : i32
    %c0_i32_1 = arith.constant 0 : i32
    return %c0_i32, %c0_i32_0 : i32, i32
  }
  func.func @transform_3(%arg0: i32) -> (i32, i32) {
    %c0_i32 = arith.constant 0 : i32
    %c0_i32_0 = arith.constant 0 : i32
    %c0_i32_1 = arith.constant 0 : i32
    return %c0_i32, %c0_i32_0 : i32, i32
  }
  func.func @transform_4(%arg0: i32) -> (i32, i32) {
    %c0_i32 = arith.constant 0 : i32
    %c0_i32_0 = arith.constant 0 : i32
    %c0_i32_1 = arith.constant 0 : i32
    return %c0_i32, %c0_i32_0 : i32, i32
  }
  func.func @transform_5(%arg0: i32) -> (i32, i32) {
    %c0_i32 = arith.constant 0 : i32
    %c0_i32_0 = arith.constant 0 : i32
    %c0_i32_1 = arith.constant 0 : i32
    return %c0_i32, %c0_i32_0 : i32, i32
  }
  func.func @transform_6(%arg0: i32) -> (i32, i32) {
    %c0_i32 = arith.constant 0 : i32
    %c0_i32_0 = arith.constant 0 : i32
    %c0_i32_1 = arith.constant 0 : i32
    return %c0_i32, %c0_i32_0 : i32, i32
  }
  func.func @transform_7(%arg0: i32) -> (i32, i32) {
    %c0_i32 = arith.constant 0 : i32
    %c0_i32_0 = arith.constant 0 : i32
    return %arg0, %c0_i32 : i32, i32
  }
}

</mosaic_0001>

<bundles_post_ra>
// kernel: tpu_custom_call.1
= control target key start
LH: loop header
LB: loop body
LE: loop exit
PB: predicated region body
PF: predicated region fallthrough
CT: control target
= control target key end

     0   :  { %12 = vsyncpa [#allocation3], 0  ;;  %s540_s24 = smov [#allocation2]   ;;  %s730_s0 = inlined_call_operand.vmem [shape: f32[8,32], index: 0, kind: input, shape index: {}]   ;;  %s731_s1 = inlined_call_operand.hbm [shape: f32[32,128], index: 1, kind: input, shape index: {}]   ;;  %s732_s2 = inlined_call_operand.vmem [shape: f32[1,128], index: 2, kind: input, shape index: {}]   ;;  %s733_s3 = inlined_call_operand.vmem [shape: f32[128,128], index: 3, kind: input, shape index: {}]   ;;  %s734_s4 = inlined_call_operand.vmem [shape: f32[1,128], index: 4, kind: input, shape index: {}]   ;;  %s735_s5 = inlined_call_operand.vmem [shape: f32[128,4], index: 5, kind: input, shape index: {}]   ;;  %s736_s6 = inlined_call_operand.vmem [shape: f32[1,4], index: 6, kind: input, shape index: {}]   ;;  %s737_s7 = inlined_call_operand.vmem [shape: f32[8,4], index: 7, kind: output, shape index: {}]  }
   0x1   :  { %s20_s25 = sshll.u32 %s540_s24, 4  ;;  %s516_s28 = scalar_lea.hbm %s731_s1, 512  ;;  %s21_s25 = int_to_ptr.vmem [resolvable:$true] %s20_s25 }
   0x2   :  { %p517_p0 = scmp.ne.s32.totalorder %s731_s1, %s516_s28  ;;  %p520_p1 = scmp.lt.u32.totalorder %s516_s28, %s731_s1 }
   0x4   :  { %p522_p2 = pnand %p520_p1, %p517_p0 }
   0x6   :  { %525 = shalt.err (!%p522_p2)
}
   0x7   :  { %s526_s10 = scalar_lea.vmem %s21_s25, 512  ;;  %p531_p4 = scmp.lt.s32.totalorder %s21_s25, %s21_s25 }
   0x8   :  { %p527_p3 = scmp.ne.s32.totalorder %s21_s25, %s526_s10  ;;  %p532_p5 = scmp.lt.s32.totalorder %s526_s10, %s526_s10 }
   0xa   :  { %p533_p6 = por %p532_p5, %p531_p4 }
   0xc   :  { %p534_p7 = pnand %p533_p6, %p527_p3 }
   0xe   :  { %537 = shalt.err (!%p534_p7)
}
   0xf   :  { %s541_s11 = smov 128   ;;  %s542_s12 = smov 8  }
  0x10   :  { %26 = dma.hbm_to_vmem [thread:$0]  %s731_s1, 512, %s21_s25, [#allocation3], %s541_s11, %s541_s11, %s542_s12  }
  0x11   :  { %538 = dma.done.wait [#allocation3], 512  }
  0x12   :  { %539 = vsyncadd [#allocation3], 4294966784  ;;  %v543_v0 = vmov 0.0|0.0   ;;  %vm544_vm0 = vmmov 0   ;;  %v545_v1 = vmov 0.0   ;;  %v41_v2 = vld [vmem:[#allocation2] sm:$0xff] }
  0x13   :  { %452 = vmatprep.subr.bf16.mxu0 %v543_v0  ;;  %379 = vmatprep.mubr.msk.f32.mxu0 %vm544_vm0, %v545_v1  ;;  %v42_v3 = vld [vmem:[#allocation2 + $0x8] sm:$0xff]  ;;  %v43_v4 = vld [vmem:[#allocation2 + $0x10] sm:$0xff]  ;;  %v44_v6 = vld [vmem:[#allocation2 + $0x18] sm:$0xff]  ;;  %vm52_vm1 = vcmask 261120   ;;  %vm320_vm2 = vcmask 31744  }
  0x14   :  { %458 = vmatprep.subr.bf16.mxu1 %v543_v0  ;;  %414 = vmatprep.mubr.msk.f32.mxu1 %vm544_vm0, %v545_v1  ;;  %v453_v5 = vpack.c.bf16 %v42_v3, %v41_v2  ;;  %v127_v7 = vld [vmem:[%s733_s3] sm:$0xff]  ;;  %v128_v8 = vld [vmem:[%s733_s3 + $0x8] sm:$0xff]  ;;  %v129_v9 = vld [vmem:[%s733_s3 + $0x10] sm:$0xff]  ;;  %v456_v11 = vpack.c.bf16 %v44_v6, %v43_v4 }
  0x15   :  { %v130_v10 = vld [vmem:[%s733_s3 + $0x18] sm:$0xff]  ;;  %v459_v12 = vpack.c.bf16 %v128_v8, %v127_v7  ;;  %v131_v14 = vld [vmem:[%s733_s3 + $0x20] sm:$0xff]  ;;  %v132_v15 = vld [vmem:[%s733_s3 + $0x28] sm:$0xff] }
  0x16   :  { %454 = vmatpush3.bf16.msra.mxu0 %v453_v5  ;;  %v462_v13 = vpack.c.bf16 %v130_v10, %v129_v9  ;;  %v40_v16 = vld [vmem:[%s730_s0] sm:$0xff]  ;;  %v465_v17 = vpack.c.bf16 %v132_v15, %v131_v14  ;;  %v133_v18 = vld [vmem:[%s733_s3 + $0x30] sm:$0xff]  ;;  %v134_v19 = vld [vmem:[%s733_s3 + $0x38] sm:$0xff] }
  0x17   :  { %455 = vmatprep.subr.bf16.mxu0 %v543_v0  ;;  %460 = vmatpush3.bf16.msra.mxu1 %v459_v12  ;;  %v468_v20 = vpack.c.bf16 %v134_v19, %v133_v18  ;;  %v135_v21 = vld [vmem:[%s733_s3 + $0x40] sm:$0xff]  ;;  %v136_v22 = vld [vmem:[%s733_s3 + $0x48] sm:$0xff]  ;;  %v137_v24 = vld [vmem:[%s733_s3 + $0x50] sm:$0xff] }
  0x18   :  { %461 = vmatprep.subr.bf16.mxu1 %v543_v0  ;;  %v471_v23 = vpack.c.bf16 %v136_v22, %v135_v21  ;;  %v138_v25 = vld [vmem:[%s733_s3 + $0x58] sm:$0xff]  ;;  %v139_v27 = vld [vmem:[%s733_s3 + $0x60] sm:$0xff]  ;;  %v140_v28 = vld [vmem:[%s733_s3 + $0x68] sm:$0xff] }
  0x19   :  { %v474_v26 = vpack.c.bf16 %v138_v25, %v137_v24  ;;  %v477_v29 = vpack.c.bf16 %v140_v28, %v139_v27  ;;  %v141_v30 = vld [vmem:[%s733_s3 + $0x70] sm:$0xff]  ;;  %v142_v31 = vld [vmem:[%s733_s3 + $0x78] sm:$0xff]  ;;  %v221_v33 = vld [vmem:[%s735_s5] sm:$0xff] }
  0x1a   :  { %457 = vmatpush3.bf16.msra.mxu0 %v456_v11  ;;  %v480_v32 = vpack.c.bf16 %v142_v31, %v141_v30  ;;  %v222_v34 = vld [vmem:[%s735_s5 + $0x8] sm:$0xff]  ;;  %v223_v35 = vld [vmem:[%s735_s5 + $0x10] sm:$0xff]  ;;  %v224_v37 = vld [vmem:[%s735_s5 + $0x18] sm:$0xff] }
  0x1b   :  { %482 = vmatprep.subr.bf16.mxu0 %v543_v0  ;;  %463 = vmatpush3.bf16.msra.mxu1 %v462_v13  ;;  %v483_v36 = vpack.c.bf16 %v222_v34, %v221_v33  ;;  %v486_v38 = vpack.c.bf16 %v224_v37, %v223_v35  ;;  %v225_v39 = vld [vmem:[%s735_s5 + $0x20] sm:$0xff]  ;;  %v226_v40 = vld [vmem:[%s735_s5 + $0x28] sm:$0xff]  ;;  %v227_v42 = vld [vmem:[%s735_s5 + $0x30] sm:$0xff] }
  0x1c   :  { %464 = vmatprep.subr.bf16.mxu1 %v543_v0  ;;  %v489_v41 = vpack.c.bf16 %v226_v40, %v225_v39  ;;  %v228_v43 = vld [vmem:[%s735_s5 + $0x38] sm:$0xff]  ;;  %v229_v45 = vld [vmem:[%s735_s5 + $0x40] sm:$0xff]  ;;  %v230_v46 = vld [vmem:[%s735_s5 + $0x48] sm:$0xff] }
  0x1d   :  { %380 = vmatmul.mubr.msk.f32.vlgmr.msra.gmra.mrb[0].mxu0 %vm52_vm1, %v40_v16  ;;  %v492_v44 = vpack.c.bf16 %v228_v43, %v227_v42  ;;  %v495_v47 = vpack.c.bf16 %v230_v46, %v229_v45  ;;  %v231_v48 = vld [vmem:[%s735_s5 + $0x50] sm:$0xff]  ;;  %v232_v49 = vld [vmem:[%s735_s5 + $0x58] sm:$0xff]  ;;  %v233_v51 = vld [vmem:[%s735_s5 + $0x60] sm:$0xff] }
  0x1e   :  { %449 = vmatprep.mubr.msk.f32.mxu0 %vm544_vm0, %v545_v1  ;;  %484 = vmatpush3.bf16.msra.mxu0 %v483_v36  ;;  %v498_v50 = vpack.c.bf16 %v232_v49, %v231_v48  ;;  %v234_v52 = vld [vmem:[%s735_s5 + $0x68] sm:$0xff]  ;;  %v327_v54 = vld [vmem:[%s732_s2] ss:$0 sm:$0xff]  ;;  %v235_v59 = vld [vmem:[%s735_s5 + $0x70] sm:$0xff] }
  0x1f   :  { %466 = vmatpush3.bf16.msra.mxu1 %v465_v17  ;;  %485 = vmatprep.subr.bf16.mxu0 %v543_v0  ;;  %v501_v53 = vpack.c.bf16 %v234_v52, %v233_v51  ;;  %v236_v60 = vld [vmem:[%s735_s5 + $0x78] sm:$0xff]  ;;  %v329_v62 = vld [vmem:[%s734_s4] ss:$0 sm:$0xff] }
  0x20   :  { %467 = vmatprep.subr.bf16.mxu1 %v543_v0  ;;  %v504_v61 = vpack.c.bf16 %v236_v60, %v235_v59  ;;  %v330_v3 = vld [vmem:[%s736_s6] ss:$0 sm:$0xff] }
  0x22   :  { %487 = vmatpush3.bf16.msra.mxu0 %v486_v38 }
  0x23   :  { %469 = vmatpush3.bf16.msra.mxu1 %v468_v20  ;;  %488 = vmatprep.subr.bf16.mxu0 %v543_v0 }
  0x24   :  { %470 = vmatprep.subr.bf16.mxu1 %v543_v0 }
  0x26   :  { %490 = vmatpush3.bf16.msra.mxu0 %v489_v41 }
  0x27   :  { %472 = vmatpush3.bf16.msra.mxu1 %v471_v23  ;;  %491 = vmatprep.subr.bf16.mxu0 %v543_v0 }
  0x28   :  { %473 = vmatprep.subr.bf16.mxu1 %v543_v0 }
  0x2a   :  { %493 = vmatpush3.bf16.msra.mxu0 %v492_v44 }
  0x2b   :  { %475 = vmatpush3.bf16.msra.mxu1 %v474_v26  ;;  %494 = vmatprep.subr.bf16.mxu0 %v543_v0 }
  0x2c   :  { %476 = vmatprep.subr.bf16.mxu1 %v543_v0 }
  0x2e   :  { %496 = vmatpush3.bf16.msra.mxu0 %v495_v47 }
  0x2f   :  { %478 = vmatpush3.bf16.msra.mxu1 %v477_v29  ;;  %497 = vmatprep.subr.bf16.mxu0 %v543_v0 }
  0x30   :  { %479 = vmatprep.subr.bf16.mxu1 %v543_v0 }
  0x32   :  { %499 = vmatpush3.bf16.msra.mxu0 %v498_v50 }
  0x33   :  { %481 = vmatpush3.bf16.msra.mxu1 %v480_v32  ;;  %500 = vmatprep.subr.bf16.mxu0 %v543_v0 }
  0x36   :  { %502 = vmatpush3.bf16.msra.mxu0 %v501_v53 }
  0x37   :  { %503 = vmatprep.subr.bf16.mxu0 %v543_v0 }
  0x3a   :  { %505 = vmatpush3.bf16.msra.mxu0 %v504_v61 }
  0xf0   :  { %v122_v55 = vpop.f32.mrb[0].mxu0 }
  0xf1   :  { %v123_v56 = vadd.f32 %v327_v54, %v122_v55  ;;  %v381_v57 = vpop.f32.mrb[1].mxu0 }
  0xf3   :  { %v126_v58 = vmax.f32 %v123_v56, 0.0 }
  0xf5   :  { %415 = vmatmul.mubr.f32.vlgmr.msra.gmra.mrb[0].mxu1 %v126_v58 }
 0x1c8   :  { %v216_v63 = vpop.f32.mrb[0].mxu1 }
 0x1c9   :  { %v217_v0 = vadd.f32 %v329_v62, %v216_v63  ;;  %v416_v1 = vpop.f32.mrb[1].mxu1 }
 0x1cb   :  { %v220_v2 = vmax.f32 %v217_v0, 0.0 }
 0x1cd   :  { %450 = vmatmul.mubr.f32.vlgmr.msra.gmra.mrb[2].mxu0 %v220_v2 }
 0x2a0   :  { %v310_v4 = vpop.f32.mrb[2].mxu0 }
 0x2a1   :  { %v311_v5 = vadd.f32 %v330_v3, %v310_v4  ;;  %v451_v6 = vpop.f32.mrb[3].mxu0 }
 0x2a3   :  { %v331_v7 = vmul.f32 -1.442695, %v311_v5 }
 0x2a5   :  { %512 = vpow2.f32 %v331_v7 }
 0x2af   :  { %v513_v8 = vpop.eup %512 }
 0x2b0   :  { %v317_v9 = vadd.f32 1.0, %v513_v8 }
 0x2b2   :  { %514 = vrcp.f32 %v317_v9 }
 0x2bc   :  { %v515_v10 = vpop.eup %514 }
 0x2bd   :  { %321 = vst.msk [vmem:[%s737_s7] sm:$0xff] %vm320_vm2, %v515_v10 }
 0x2be   :  { %326 = vsyncpa [#allocation3], 1 }

</bundles_post_ra>
